<compile_context>
chip_gen: v5e
topology: v5e:2x2
jax: 0.10.0
libtpu: 0.0.40
codegen_flags: <defaults>
</compile_context>

<pallas_src>
import jax
import jax.numpy as jnp
from jax.experimental import pallas as pl
from jax.experimental.pallas import tpu as pltpu


# Set to jnp.bfloat16 on v6e/v7x for ~2x MXU throughput (accumulation stays in
# f32); kept at f32 here to match the PyTorch float32 reference numerics.
MXU_INPUT_DTYPE = jnp.float32

# Explicit scoped-VMEM budget: safe on v5e (128 MiB phys), v6e (128 MiB) and
# v7x (64 MiB phys); raise per-generation if tiles are enlarged.
VMEM_LIMIT = 32 * 1024 * 1024


# ----------------------------- activations ---------------------------------

def _identity(x):
    return x


def _gelu_tanh(x):
    # TODO(synk): torch nn.GELU defaults to exact erf-GELU; tanh approximation
    # is used here for guaranteed Mosaic lowering.
    return 0.5 * x * (1.0 + jnp.tanh(0.7978845608028654 * (x + 0.044715 * x * x * x)))


_ACTS = {None: _identity, "gelu": _gelu_tanh}


def cast_tuple(val, length=1):
    return val if isinstance(val, tuple) else (val,) * length


# ----------------------------- Pallas kernels -------------------------------

def matmul(a, b, bias=None, activation=None, residual=None,
           ln_g=None, ln_b=None, ln_eps=1e-5, tile_m=256, tile_k=1024):
    """Fused (LayerNorm over K)? -> (M,K)@(K,N) + bias -> act -> (+residual).

    Tiled over M (parallel, pipelined) and K (arbitrary, f32 VMEM accumulator).
    """
    a = a.astype(jnp.float32)
    b = b.astype(jnp.float32)
    M, K = a.shape
    K2, N = b.shape
    assert K == K2
    has_ln = ln_g is not None
    has_res = residual is not None
    act = _ACTS[activation]

    tm = M if M <= tile_m else tile_m              # full dim or mult-of-8 tile
    if (not has_ln) and K > tile_k and K % tile_k == 0:
        tk = tile_k
    else:
        tk = K
    mt = pl.cdiv(M, tm)
    kt = K // tk
    if has_ln:
        assert kt == 1, "fused LayerNorm requires an untiled contraction dim"

    bias2 = (jnp.zeros((1, N), jnp.float32) if bias is None
             else bias.reshape(1, N).astype(jnp.float32))

    inputs = [a, b, bias2]
    in_specs = [pl.BlockSpec((tm, tk), lambda i, k: (i, k)),
                pl.BlockSpec((tk, N), lambda i, k: (k, 0)),
                pl.BlockSpec((1, N), lambda i, k: (0, 0))]
    if has_ln:
        inputs += [ln_g.reshape(1, K).astype(jnp.float32),
                   ln_b.reshape(1, K).astype(jnp.float32)]
        in_specs += [pl.BlockSpec((1, K), lambda i, k: (0, 0)),
                     pl.BlockSpec((1, K), lambda i, k: (0, 0))]
    if has_res:
        inputs.append(residual.astype(jnp.float32))
        in_specs.append(pl.BlockSpec((tm, N), lambda i, k: (i, 0)))

    def kernel(*refs):
        a_ref, b_ref, bias_ref = refs[0], refs[1], refs[2]
        idx = 3
        if has_ln:
            lng_ref, lnb_ref = refs[idx], refs[idx + 1]
            idx += 2
        if has_res:
            res_ref = refs[idx]
            idx += 1
        o_ref, acc_ref = refs[idx], refs[idx + 1]

        kk = pl.program_id(1)

        @pl.when(kk == 0)
        def _():
            acc_ref[...] = jnp.zeros_like(acc_ref)

        av = a_ref[...]
        if has_ln:
            mean = jnp.mean(av, axis=-1, keepdims=True)
            var = jnp.mean((av - mean) ** 2, axis=-1, keepdims=True)
            av = (av - mean) * jax.lax.rsqrt(var + ln_eps) * lng_ref[...] + lnb_ref[...]
        acc_ref[...] += jnp.dot(av.astype(MXU_INPUT_DTYPE),
                                b_ref[...].astype(MXU_INPUT_DTYPE),
                                preferred_element_type=jnp.float32)

        @pl.when(kk == kt - 1)
        def _():
            y = act(acc_ref[...] + bias_ref[...])
            if has_res:
                y = y + res_ref[...]
            o_ref[...] = y.astype(o_ref.dtype)

    cost = pl.CostEstimate(
        flops=2 * M * K * N, transcendentals=0,
        bytes_accessed=4 * (M * K + K * N + M * N * (2 if has_res else 1)))

    return pl.pallas_call(
        kernel,
        out_shape=jax.ShapeDtypeStruct((M, N), jnp.float32),
        grid=(mt, kt),
        in_specs=in_specs,
        out_specs=pl.BlockSpec((tm, N), lambda i, k: (i, 0)),
        scratch_shapes=[pltpu.VMEM((tm, N), jnp.float32)],
        compiler_params=pltpu.CompilerParams(
            dimension_semantics=("parallel", "arbitrary"),
            vmem_limit_bytes=VMEM_LIMIT),
        cost_estimate=cost,
    )(*inputs)


def attention(q, k, v, scale, tile_g=128):
    """Fused batched attention over (G, N, D) groups, many groups per step."""
    q = q.astype(jnp.float32)
    k = k.astype(jnp.float32)
    v = v.astype(jnp.float32)
    G, N, Dq = q.shape
    Dv = v.shape[-1]
    tg = G if G <= tile_g else tile_g

    def kernel(q_ref, k_ref, v_ref, o_ref):
        qq = q_ref[...] * scale
        # contract last dims directly (no explicit k.T / XLU transpose pass)
        s = jnp.einsum('gnd,gmd->gnm', qq, k_ref[...],
                       preferred_element_type=jnp.float32)
        s = s - jnp.max(s, axis=-1, keepdims=True)
        p = jnp.exp(s)
        p = p * pl.reciprocal(jnp.sum(p, axis=-1, keepdims=True), approx=True)
        o = jnp.einsum('gnm,gmd->gnd', p, v_ref[...],
                       preferred_element_type=jnp.float32)
        o_ref[...] = o.astype(o_ref.dtype)

    cost = pl.CostEstimate(flops=2 * G * N * N * (Dq + Dv),
                           transcendentals=G * N * N,
                           bytes_accessed=4 * G * N * (2 * Dq + 2 * Dv))

    return pl.pallas_call(
        kernel,
        out_shape=jax.ShapeDtypeStruct((G, N, Dv), jnp.float32),
        grid=(pl.cdiv(G, tg),),
        in_specs=[pl.BlockSpec((tg, N, Dq), lambda g: (g, 0, 0)),
                  pl.BlockSpec((tg, N, Dq), lambda g: (g, 0, 0)),
                  pl.BlockSpec((tg, N, Dv), lambda g: (g, 0, 0))],
        out_specs=pl.BlockSpec((tg, N, Dv), lambda g: (g, 0, 0)),
        compiler_params=pltpu.CompilerParams(
            dimension_semantics=("parallel",),
            vmem_limit_bytes=VMEM_LIMIT),
        cost_estimate=cost,
    )(q, k, v)


def layernorm_rows(x2d, g, b, eps=1e-5, activation=None, tile_m=512):
    """LayerNorm over the last dim of an (M, C) slab (biased variance), with
    optional fused activation. Tiled over rows, parallel grid."""
    x2d = x2d.astype(jnp.float32)
    M, C = x2d.shape
    g2 = g.reshape(1, C).astype(jnp.float32)
    b2 = b.reshape(1, C).astype(jnp.float32)
    act = _ACTS[activation]
    tm = M if M <= tile_m else tile_m

    def kernel(x_ref, g_ref, b_ref, o_ref):
        x = x_ref[...]
        mean = jnp.mean(x, axis=-1, keepdims=True)
        var = jnp.mean((x - mean) ** 2, axis=-1, keepdims=True)
        y = (x - mean) * jax.lax.rsqrt(var + eps) * g_ref[...] + b_ref[...]
        o_ref[...] = act(y).astype(o_ref.dtype)

    return pl.pallas_call(
        kernel,
        out_shape=jax.ShapeDtypeStruct((M, C), jnp.float32),
        grid=(pl.cdiv(M, tm),),
        in_specs=[pl.BlockSpec((tm, C), lambda i: (i, 0)),
                  pl.BlockSpec((1, C), lambda i: (0, 0)),
                  pl.BlockSpec((1, C), lambda i: (0, 0))],
        out_specs=pl.BlockSpec((tm, C), lambda i: (i, 0)),
        compiler_params=pltpu.CompilerParams(
            dimension_semantics=("parallel",),
            vmem_limit_bytes=VMEM_LIMIT),
    )(x2d, g2, b2)


def peg(x, w, b):
    """PEG: depthwise 3x3 conv (groups=C, pad=1) + residual, NHWC.

    The padded slab is DMA'd once per image and the 9 taps are produced with
    static in-VMEM slices (no 9x duplicated HBM stack)."""
    B, H, W, C = x.shape
    x = x.astype(jnp.float32)
    xp = jnp.pad(x, ((0, 0), (1, 1), (1, 1), (0, 0)))
    wk = w.reshape(C, 9).T.astype(jnp.float32)     # (9, C); tap k = dy*3 + dx
    bias = b.reshape(1, C).astype(jnp.float32)

    def kernel(xp_ref, x_ref, w_ref, b_ref, o_ref):
        xpad = xp_ref[0]                           # (H+2, W+2, C) in VMEM
        wv = w_ref[...]                            # (9, C)
        acc = x_ref[0] + b_ref[...]                # residual + bias, (H, W, C)
        for dy in range(3):
            for dx in range(3):
                tap = dy * 3 + dx
                acc = acc + xpad[dy:dy + H, dx:dx + W, :] * wv[tap:tap + 1, :]
        o_ref[0] = acc.astype(o_ref.dtype)

    # TODO(synk): for large feature maps, additionally tile over row-bands.
    return pl.pallas_call(
        kernel,
        out_shape=jax.ShapeDtypeStruct((B, H, W, C), jnp.float32),
        grid=(B,),
        in_specs=[pl.BlockSpec((1, H + 2, W + 2, C), lambda bb: (bb, 0, 0, 0)),
                  pl.BlockSpec((1, H, W, C), lambda bb: (bb, 0, 0, 0)),
                  pl.BlockSpec((9, C), lambda bb: (0, 0)),
                  pl.BlockSpec((1, C), lambda bb: (0, 0))],
        out_specs=pl.BlockSpec((1, H, W, C), lambda bb: (bb, 0, 0, 0)),
        compiler_params=pltpu.CompilerParams(
            dimension_semantics=("parallel",),
            vmem_limit_bytes=VMEM_LIMIT),
    )(xp, x, wk, bias)


def se_layer(x, w1, w2, ln_g=None, ln_b=None, ln_eps=1e-5):
    # TODO(synk): SELayer is not defined in the reference source; a standard
    # squeeze-excitation (global-avg-pool -> FC -> ReLU -> FC -> sigmoid ->
    # scale) is implemented, fully fused into a single kernel.  The stage's
    # trailing ChanLayerNorm (when present) is fused in as well.
    B, H, W, C = x.shape
    hid = w1.shape[1]
    xr = x.reshape(B, H * W, C).astype(jnp.float32)
    has_ln = ln_g is not None

    inputs = [xr, w1.astype(jnp.float32), w2.astype(jnp.float32)]
    in_specs = [pl.BlockSpec((1, H * W, C), lambda bb: (bb, 0, 0)),
                pl.BlockSpec((C, hid), lambda bb: (0, 0)),
                pl.BlockSpec((hid, C), lambda bb: (0, 0))]
    if has_ln:
        inputs += [ln_g.reshape(1, C).astype(jnp.float32),
                   ln_b.reshape(1, C).astype(jnp.float32)]
        in_specs += [pl.BlockSpec((1, C), lambda bb: (0, 0)),
                     pl.BlockSpec((1, C), lambda bb: (0, 0))]

    def kernel(*refs):
        x_ref, w1_ref, w2_ref = refs[0], refs[1], refs[2]
        idx = 3
        if has_ln:
            g_ref, b_ref = refs[idx], refs[idx + 1]
            idx += 2
        o_ref = refs[idx]

        xb = x_ref[0]                                       # (HW, C)
        if has_ln:                                          # fused ChanLayerNorm
            mean = jnp.mean(xb, axis=-1, keepdims=True)
            var = jnp.mean((xb - mean) ** 2, axis=-1, keepdims=True)
            xb = (xb - mean) * jax.lax.rsqrt(var + ln_eps) * g_ref[...] + b_ref[...]
        pooled = jnp.mean(xb, axis=0, keepdims=True)        # (1, C)
        h = jnp.maximum(jnp.dot(pooled, w1_ref[...],
                                preferred_element_type=jnp.float32), 0.0)
        s = jnp.dot(h, w2_ref[...], preferred_element_type=jnp.float32)
        s = pl.reciprocal(1.0 + jnp.exp(-s), approx=True)   # sigmoid on EUP
        o_ref[0] = (xb * s).astype(o_ref.dtype)

    out = pl.pallas_call(
        kernel,
        out_shape=jax.ShapeDtypeStruct((B, H * W, C), jnp.float32),
        grid=(B,),
        in_specs=in_specs,
        out_specs=pl.BlockSpec((1, H * W, C), lambda bb: (bb, 0, 0)),
        compiler_params=pltpu.CompilerParams(
            dimension_semantics=("parallel",),
            vmem_limit_bytes=VMEM_LIMIT),
    )(*inputs)
    return out.reshape(B, H, W, C)


# ----------------------------- model pieces (glue + kernels) ----------------

def overlapping_patch_embed(x, w, b, stride):
    """Strided conv via im2col (glue) + tiled Pallas matmul. x: NHWC, w: (Co,Ci,k,k)."""
    B, H, W, Cin = x.shape
    k = 2 * stride - 1
    p = k // 2
    Cout = w.shape[0]
    Ho = (H + 2 * p - k) // stride + 1
    Wo = (W + 2 * p - k) // stride + 1
    xp = jnp.pad(x, ((0, 0), (p, p), (p, p), (0, 0)))
    pats = []
    for dy in range(k):
        for dx in range(k):
            pats.append(xp[:, dy:dy + stride * (Ho - 1) + 1:stride,
                           dx:dx + stride * (Wo - 1) + 1:stride, :])
    a = jnp.stack(pats, axis=3).reshape(B * Ho * Wo, k * k * Cin)
    wm = jnp.transpose(w, (2, 3, 1, 0)).reshape(k * k * Cin, Cout)
    # TODO(synk): for large resolutions, replace the k^2 im2col duplication
    # with a Pallas kernel that builds patch rows from row-bands in VMEM.
    out = matmul(a, wm, bias=b)
    return out.reshape(B, Ho, Wo, Cout)


def dssa(x, p, heads, dim_head, wsz, ln_g, ln_b):
    """PreNorm(DSSA) + residual.  The ChanLayerNorm is fused into the to_qkv
    projection matmul (the un-normalized window-token row gets its qkv from a
    tiny separate projection); the residual add is fused into to_out."""
    B, H, W, C = x.shape
    X, Y = H // wsz, W // wsz
    nw = X * Y
    inner = heads * dim_head
    scale = dim_head ** -0.5
    residual2d = x.reshape(-1, C)

    # b c (h w1) (w w2) -> (b h w) (w1 w2) c   [channels-last, un-normalized]
    xw = x.reshape(B, X, wsz, Y, wsz, C).transpose(0, 1, 3, 2, 4, 5)
    xw = xw.reshape(B * nw, wsz * wsz, C)
    Bp = B * nw
    N = wsz * wsz + 1

    # spatial rows: LayerNorm fused into the qkv matmul
    qkv_sp = matmul(xw.reshape(Bp * wsz * wsz, C), p['to_qkv_w'],
                    ln_g=ln_g, ln_b=ln_b).reshape(Bp, wsz * wsz, 3 * inner)
    # window-token row (not normalized in the reference): trivial (1,C)@(C,3I)
    tok_qkv = jnp.dot(p['window_tokens'].reshape(1, C).astype(jnp.float32),
                      p['to_qkv_w'].astype(jnp.float32))
    tok_qkv = jnp.broadcast_to(tok_qkv.reshape(1, 1, 3 * inner), (Bp, 1, 3 * inner))
    qkv = jnp.concatenate([tok_qkv, qkv_sp], axis=1)        # token at index 0
    q, k_, v = jnp.split(qkv, 3, axis=-1)

    def to_heads(t):
        return (t.reshape(Bp, N, heads, dim_head)
                 .transpose(0, 2, 1, 3)
                 .reshape(Bp * heads, N, dim_head))

    out = attention(to_heads(q), to_heads(k_), to_heads(v), scale)
    out = out.reshape(Bp, heads, N, dim_head)
    win_tok = out[:, :, 0]        # (Bp, h, d)
    win_fmap = out[:, :, 1:]      # (Bp, h, wsz*wsz, d)

    if nw == 1:
        fmap = win_fmap.transpose(0, 2, 1, 3).reshape(B, wsz, wsz, inner)
    else:
        win_tok = win_tok.reshape(B, nw, heads, dim_head).transpose(0, 2, 1, 3)
        win_fmap = win_fmap.reshape(B, nw, heads, wsz * wsz, dim_head).transpose(0, 2, 1, 3, 4)

        # window_tokens_to_qk: LayerNorm(d) + GELU (fused in kernel) -> 1x1 conv
        t = layernorm_rows(win_tok.reshape(-1, dim_head), p['wt_ln_g'], p['wt_ln_b'],
                           activation='gelu').reshape(B, heads, nw, dim_head)
        t = t.transpose(0, 2, 1, 3).reshape(B * nw, inner)          # head-major channels
        wqk = matmul(t, p['wt_qk_w'], bias=p['wt_qk_b'])
        wqk = wqk.reshape(B, nw, heads, 2 * dim_head).transpose(0, 2, 1, 3)
        w_q = wqk[..., :dim_head].reshape(B * heads, nw, dim_head)
        w_k = wqk[..., dim_head:].reshape(B * heads, nw, dim_head)

        # einsum('bhij,bhjwd->bhiwd') folded into the fused attention kernel
        vagg = win_fmap.reshape(B * heads, nw, wsz * wsz * dim_head)
        agg = attention(w_q, w_k, vagg, scale)
        agg = agg.reshape(B, heads, X, Y, wsz, wsz, dim_head)
        fmap = agg.transpose(0, 2, 4, 3, 5, 1, 6).reshape(B, X * wsz, Y * wsz, inner)

    out2 = matmul(fmap.reshape(-1, inner), p['to_out_w'], bias=p['to_out_b'],
                  residual=residual2d)
    return out2.reshape(B, H, W, C)


def feed_forward(x, layer):
    """PreNorm(FeedForward) + residual: the ChanLayerNorm is fused into the
    first matmul, the residual add is fused into the second matmul."""
    B, H, W, C = x.shape
    x2d = x.reshape(-1, C)
    h = matmul(x2d, layer['ff_w1'], bias=layer['ff_b1'], activation='gelu',
               ln_g=layer['ff_norm_g'], ln_b=layer['ff_norm_b'])
    out = matmul(h, layer['ff_w2'], bias=layer['ff_b2'], residual=x2d)
    return out.reshape(B, H, W, C)


def sesepvit_forward(params, x_nchw, cfg):
    x = jnp.transpose(x_nchw, (0, 2, 3, 1)).astype(jnp.float32)   # NCHW -> NHWC
    for st in params['stages']:
        x = overlapping_patch_embed(x, st['ope_w'], st['ope_b'], st['stride'])
        x = peg(x, st['peg_w'], st['peg_b'])
        for layer in st['layers']:
            # PreNorm's ChanLayerNorm + residual fused inside dssa
            x = dssa(x, layer['dssa'], st['heads'], cfg['dim_head'],
                     st['window_size'], layer['attn_norm_g'], layer['attn_norm_b'])
            x = feed_forward(x, layer)                        # LN + residual fused
        # stage-output ChanLayerNorm (if any) fused into the SE kernel
        x = se_layer(x, st['se_w1'], st['se_w2'],
                     ln_g=st['norm_g'], ln_b=st['norm_b'])
    pooled = jnp.mean(x, axis=(1, 2))
    # mlp head: LayerNorm fused into the classifier matmul
    return matmul(pooled, params['head_w'], bias=params['head_b'],
                  ln_g=params['head_ln_g'], ln_b=params['head_ln_b'])


# ----------------------------- parameter init -------------------------------

def init_params(key, cfg):
    num_stages = len(cfg['depth'])
    dims = tuple(2 ** i * cfg['dim'] for i in range(num_stages))
    all_dims = (cfg['channels'],) + dims
    strides = (4,) + (2,) * (num_stages - 1)
    heads = cast_tuple(cfg['heads'], num_stages)
    wsizes = cast_tuple(cfg['window_size'], num_stages)

    kit = iter(jax.random.split(key, 512))

    def nrm(shape, std=0.02):
        return jax.random.normal(next(kit), shape, jnp.float32) * std

    stages = []
    for ind in range(num_stages):
        dim_in, dim_out = all_dims[ind], all_dims[ind + 1]
        stride = strides[ind]
        h = heads[ind]
        inner = h * cfg['dim_head']
        inner_ff = dim_out * cfg['ff_mult']
        is_last = ind == num_stages - 1
        ksz = 2 * stride - 1

        layers = []
        for _ in range(cfg['depth'][ind]):
            layers.append(dict(
                attn_norm_g=jnp.ones((dim_out,), jnp.float32),
                attn_norm_b=jnp.zeros((dim_out,), jnp.float32),
                dssa=dict(
                    to_qkv_w=nrm((dim_out, 3 * inner)),
                    window_tokens=jax.random.normal(next(kit), (dim_out,), jnp.float32),
                    wt_ln_g=jnp.ones((cfg['dim_head'],), jnp.float32),
                    wt_ln_b=jnp.zeros((cfg['dim_head'],), jnp.float32),
                    wt_qk_w=nrm((inner, 2 * inner)),
                    wt_qk_b=jnp.zeros((2 * inner,), jnp.float32),
                    to_out_w=nrm((inner, dim_out)),
                    to_out_b=jnp.zeros((dim_out,), jnp.float32),
                ),
                ff_norm_g=jnp.ones((dim_out,), jnp.float32),
                ff_norm_b=jnp.zeros((dim_out,), jnp.float32),
                ff_w1=nrm((dim_out, inner_ff)),
                ff_b1=jnp.zeros((inner_ff,), jnp.float32),
                ff_w2=nrm((inner_ff, dim_out)),
                ff_b2=jnp.zeros((dim_out,), jnp.float32),
            ))

        se_hidden = max(1, dim_out // 16)
        stages.append(dict(
            ope_w=nrm((dim_out, dim_in, ksz, ksz)),
            ope_b=jnp.zeros((dim_out,), jnp.float32),
            peg_w=nrm((dim_out, 1, 3, 3)),
            peg_b=jnp.zeros((dim_out,), jnp.float32),
            layers=layers,
            norm_g=None if is_last else jnp.ones((dim_out,), jnp.float32),
            norm_b=None if is_last else jnp.zeros((dim_out,), jnp.float32),
            se_w1=nrm((dim_out, se_hidden)),
            se_w2=nrm((se_hidden, dim_out)),
            heads=h, window_size=wsizes[ind], stride=stride, is_last=is_last,
        ))

    return dict(
        stages=stages,
        head_ln_g=jnp.ones((dims[-1],), jnp.float32),
        head_ln_b=jnp.zeros((dims[-1],), jnp.float32),
        head_w=nrm((dims[-1], cfg['num_classes'])),
        head_b=jnp.zeros((cfg['num_classes'],), jnp.float32),
    )


# ----------------------------- main -----------------------------------------

CFG = dict(num_classes=10, dim=32, depth=(1, 1), heads=(1, 2),
           window_size=2, dim_head=16, ff_mult=2, channels=3)

if __name__ == "__main__":
    key = jax.random.PRNGKey(0)
    pkey, xkey = jax.random.split(key)
    params = init_params(pkey, CFG)
    # Input in NCHW (PyTorch convention): batch=2, channels=3, 16x16 spatial.
    x = jax.random.normal(xkey, (2, CFG['channels'], 16, 16), jnp.float32)
    logits = sesepvit_forward(params, x, CFG)
    logits = jax.block_until_ready(logits)
    assert logits.shape == (2, CFG['num_classes'])
    assert bool(jnp.all(jnp.isfinite(logits)))
    print("KERNEL_OK")
</pallas_src>

<mosaic_0001>
module attributes {stable_mosaic.version = 11 : i64} {
  func.func @kernel(%arg0: i32, %arg1: i32, %arg2: memref<32x147xf32, #tpu.memory_space<vmem>>, %arg3: memref<147x32xf32, #tpu.memory_space<vmem>>, %arg4: memref<1x32xf32, #tpu.memory_space<vmem>>, %arg5: memref<32x32xf32, #tpu.memory_space<vmem>>, %arg6: memref<32x32xf32, #tpu.memory_space<vmem>>) attributes {dimension_semantics = [#tpu.dimension_semantics<parallel>, #tpu.dimension_semantics<arbitrary>], iteration_bounds = array<i64: 1, 1>, scalar_prefetch = 0 : i64, scratch_operands = 1 : i64, tpu.core_type = #tpu.core_type<tc>, window_params = [{transform_indices = @transform_0, window_bounds = array<i64: 32, 147>}, {transform_indices = @transform_1, window_bounds = array<i64: 147, 32>}, {pipeline_mode = #tpu.pipeline_mode<synchronous>, transform_indices = @transform_2, window_bounds = array<i64: 1, 32>}, {transform_indices = @transform_3, window_bounds = array<i64: 32, 32>}]} {
    %c0_i32 = arith.constant 0 : i32
    %0 = arith.cmpi eq, %arg1, %c0_i32 : i32
    %1 = arith.extui %0 : i1 to i32
    %c0_i32_0 = arith.constant 0 : i32
    %2 = arith.cmpi ne, %1, %c0_i32_0 : i32
    scf.if %2 {
      %cst_10 = arith.constant 0.000000e+00 : f32
      %12 = vector.broadcast %cst_10 : f32 to vector<32x32xf32>
      %c0_11 = arith.constant 0 : index
      %c0_12 = arith.constant 0 : index
      %13 = vector.load %arg6[%c0_11, %c0_12] : memref<32x32xf32, #tpu.memory_space<vmem>>, vector<32x32xf32>
      tpu.vector_store %arg6[%c0_11, %c0_12], %12 {strides = array<i32>} : memref<32x32xf32, #tpu.memory_space<vmem>>, vector<32x32xf32>,
    } else {
    }
    %c0 = arith.constant 0 : index
    %c0_1 = arith.constant 0 : index
    %3 = vector.load %arg2[%c0, %c0_1] : memref<32x147xf32, #tpu.memory_space<vmem>>, vector<32x147xf32>
    %c0_2 = arith.constant 0 : index
    %c0_3 = arith.constant 0 : index
    %4 = vector.load %arg6[%c0_2, %c0_3] : memref<32x32xf32, #tpu.memory_space<vmem>>, vector<32x32xf32>
    %c0_4 = arith.constant 0 : index
    %c0_5 = arith.constant 0 : index
    %5 = vector.load %arg3[%c0_4, %c0_5] : memref<147x32xf32, #tpu.memory_space<vmem>>, vector<147x32xf32>
    %cst = arith.constant dense<0.000000e+00> : vector<32x32xf32>
    %6 = tpu.matmul %3, %5, %cst {dimension_numbers = #tpu.dot_dimension_numbers<[1], [0], [0], [1], [0, 0, 1, 1], [], []>} : vector<32x147xf32>, vector<147x32xf32>, vector<32x32xf32> -> vector<32x32xf32>
    %7 = arith.addf %4, %6 : vector<32x32xf32>
    %c0_6 = arith.constant 0 : index
    %c0_7 = arith.constant 0 : index
    %8 = vector.load %arg6[%c0_6, %c0_7] : memref<32x32xf32, #tpu.memory_space<vmem>>, vector<32x32xf32>
    tpu.vector_store %arg6[%c0_6, %c0_7], %7 {strides = array<i32>} : memref<32x32xf32, #tpu.memory_space<vmem>>, vector<32x32xf32>,
    %c0_i32_8 = arith.constant 0 : i32
    %9 = arith.cmpi eq, %arg1, %c0_i32_8 : i32
    %10 = arith.extui %9 : i1 to i32
    %c0_i32_9 = arith.constant 0 : i32
    %11 = arith.cmpi ne, %10, %c0_i32_9 : i32
    scf.if %11 {
      %c0_10 = arith.constant 0 : index
      %c0_11 = arith.constant 0 : index
      %12 = vector.load %arg6[%c0_10, %c0_11] : memref<32x32xf32, #tpu.memory_space<vmem>>, vector<32x32xf32>
      %c0_12 = arith.constant 0 : index
      %c0_13 = arith.constant 0 : index
      %13 = vector.load %arg4[%c0_12, %c0_13] : memref<1x32xf32, #tpu.memory_space<vmem>>, vector<1x32xf32>
      %14 = vector.broadcast %13 : vector<1x32xf32> to vector<32x32xf32>
      %15 = arith.addf %12, %14 : vector<32x32xf32>
      %c0_14 = arith.constant 0 : index
      %c0_15 = arith.constant 0 : index
      %16 = vector.load %arg5[%c0_14, %c0_15] : memref<32x32xf32, #tpu.memory_space<vmem>>, vector<32x32xf32>
      tpu.vector_store %arg5[%c0_14, %c0_15], %15 {strides = array<i32>} : memref<32x32xf32, #tpu.memory_space<vmem>>, vector<32x32xf32>,
    } else {
    }
    return
  }
  func.func @transform_0(%arg0: i32, %arg1: i32) -> (i32, i32) {
    %c0_i32 = arith.constant 0 : i32
    return %arg0, %arg1 : i32, i32
  }
  func.func @transform_1(%arg0: i32, %arg1: i32) -> (i32, i32) {
    %c0_i32 = arith.constant 0 : i32
    %c0_i32_0 = arith.constant 0 : i32
    return %arg1, %c0_i32 : i32, i32
  }
  func.func @transform_2(%arg0: i32, %arg1: i32) -> (i32, i32) {
    %c0_i32 = arith.constant 0 : i32
    %c0_i32_0 = arith.constant 0 : i32
    %c0_i32_1 = arith.constant 0 : i32
    return %c0_i32, %c0_i32_0 : i32, i32
  }
  func.func @transform_3(%arg0: i32, %arg1: i32) -> (i32, i32) {
    %c0_i32 = arith.constant 0 : i32
    %c0_i32_0 = arith.constant 0 : i32
    return %arg0, %c0_i32 : i32, i32
  }
}

</mosaic_0001>

<bundles_post_ra>
// kernel: tpu_custom_call.1
= control target key start
LH: loop header
LB: loop body
LE: loop exit
PB: predicated region body
PF: predicated region fallthrough
CT: control target
= control target key end

     0   :  { %vm68_vm0 = vcmask 1042432   ;;  %vm55_vm1 = vcmask 154624   ;;  %s371_s0 = inlined_call_operand.vmem [shape: f32[32,147], index: 0, kind: input, shape index: {}]   ;;  %s372_s1 = inlined_call_operand.vmem [shape: f32[147,32], index: 1, kind: input, shape index: {}]   ;;  %s373_s2 = inlined_call_operand.vmem [shape: f32[1,32], index: 2, kind: input, shape index: {}]   ;;  %s374_s3 = inlined_call_operand.hbm [shape: f32[32,32], index: 3, kind: output, shape index: {}]  }
   0x1   :  { %v51_v0 = vld [vmem:[%s372_s1 + $0x78] sm:$0xff]  ;;  %v50_v1 = vld [vmem:[%s372_s1 + $0x70] sm:$0xff]  ;;  %v49_v2 = vld [vmem:[%s372_s1 + $0x68] sm:$0xff] }
   0x2   :  { %72 = vmatpush.msra.mxu0 %v51_v0  ;;  %181 = vmatpush.msra.mxu2 %v51_v0  ;;  %v54_v3 = vld [vmem:[%s372_s1 + $0x90] sm:$0x7]  ;;  %v53_v4 = vld [vmem:[%s372_s1 + $0x88] sm:$0xff]  ;;  %v48_v5 = vld [vmem:[%s372_s1 + $0x60] sm:$0xff] }
   0x3   :  { %182 = vmatpush.msra.mxu3 %v51_v0  ;;  %176 = vmatpush.msk.msra.mxu1 %vm68_vm0, %v54_v3  ;;  %v52_v6 = vld [vmem:[%s372_s1 + $0x80] sm:$0xff]  ;;  %v47_v7 = vld [vmem:[%s372_s1 + $0x58] sm:$0xff]  ;;  %v25_v8 = vld [vmem:[%s371_s0 + $0x8] sm:$0xff] }
   0x4   :  { %73 = vmatpush.msra.mxu0 %v50_v1  ;;  %183 = vmatpush.msra.mxu2 %v50_v1  ;;  %v46_v9 = vld [vmem:[%s372_s1 + $0x50] sm:$0xff] }
   0x5   :  { %184 = vmatpush.msra.mxu3 %v50_v1  ;;  %115 = vmatpush.msra.mxu1 %v53_v4 }
   0x6   :  { %74 = vmatpush.msra.mxu0 %v49_v2  ;;  %185 = vmatpush.msra.mxu2 %v49_v2 }
   0x7   :  { %186 = vmatpush.msra.mxu3 %v49_v2  ;;  %116 = vmatpush.msra.mxu1 %v52_v6 }
   0x8   :  { %75 = vmatpush.msra.mxu0 %v48_v5  ;;  %187 = vmatpush.msra.mxu2 %v48_v5 }
   0x9   :  { %188 = vmatpush.msra.mxu3 %v48_v5 }
   0xa   :  { %8 = vsyncpa [#allocation4], 0  ;;  %76 = vmatpush.msra.mxu0 %v47_v7  ;;  %189 = vmatpush.msra.mxu2 %v47_v7  ;;  %v45_v10 = vld [vmem:[%s372_s1 + $0x48] sm:$0xff]  ;;  %v44_v11 = vld [vmem:[%s372_s1 + $0x40] sm:$0xff]  ;;  %vm19_vm2 = vcmask 261120   ;;  %v244_v27 = vmov 0.0  }
   0xb   :  { %190 = vmatpush.msra.mxu3 %v47_v7  ;;  %177 = vmatmul.msk.f32.vlgmr.msra.gmra.mxu1 %vm55_vm1, %v25_v8  ;;  %v43_v12 = vld [vmem:[%s372_s1 + $0x38] sm:$0xff]  ;;  %v42_v14 = vld [vmem:[%s372_s1 + $0x30] sm:$0xff]  ;;  %v41_v15 = vld [vmem:[%s372_s1 + $0x28] sm:$0xff]  ;;  %20 = vst.msk [vmem:[#allocation2] sm:$0xff] %vm19_vm2, %v244_v27  ;;  %s164_s15 = sshll.u32 %s374_s3, 4  ;;  %s246_s16 = smov 128   ;;  %s165_s15 = int_to_ptr.hbm [resolvable:$true] %s164_s15 }
   0xc   :  { %77 = vmatpush.msra.mxu0 %v46_v9  ;;  %191 = vmatpush.msra.mxu2 %v46_v9  ;;  %v27_v13 = vld [vmem:[%s371_s0 + $0x18] sm:$0xff]  ;;  %v40_v16 = vld [vmem:[%s372_s1 + $0x20] sm:$0xff]  ;;  %v29_v18 = vld [vmem:[%s371_s0 + $0x28] sm:$0xff]  ;;  %21 = vst.msk [vmem:[#allocation2 + $0x8] sm:$0xff] %vm19_vm2, %v244_v27  ;;  %s247_s17 = smov 8  }
   0xd   :  { %192 = vmatpush.msra.mxu3 %v46_v9  ;;  %v39_v17 = vld [vmem:[%s372_s1 + $0x18] sm:$0xff]  ;;  %v38_v19 = vld [vmem:[%s372_s1 + $0x10] sm:$0xff]  ;;  %v37_v20 = vld [vmem:[%s372_s1 + $0x8] sm:$0xff]  ;;  %22 = vst.msk [vmem:[#allocation2 + $0x10] sm:$0xff] %vm19_vm2, %v244_v27 }
   0xe   :  { %78 = vmatpush.msra.mxu0 %v45_v10  ;;  %193 = vmatpush.msra.mxu2 %v45_v10  ;;  %v36_v21 = vld [vmem:[%s372_s1] sm:$0xff]  ;;  %v26_v23 = vld [vmem:[%s371_s0 + $0x10] sm:$0xff]  ;;  %v31_v25 = vld [vmem:[%s371_s0 + $0x38] sm:$0xff]  ;;  %23 = vst.msk [vmem:[#allocation2 + $0x18] sm:$0xff] %vm19_vm2, %v244_v27 }
   0xf   :  { %194 = vmatpush.msra.mxu3 %v45_v10  ;;  %v24_v22 = vld [vmem:[%s371_s0] sm:$0xff]  ;;  %v30_v26 = vld [vmem:[%s371_s0 + $0x30] sm:$0xff] }
  0x10   :  { %79 = vmatpush.msra.mxu0 %v44_v11  ;;  %195 = vmatpush.msra.mxu2 %v44_v11  ;;  %v28_v24 = vld [vmem:[%s371_s0 + $0x20] sm:$0xff] }
  0x11   :  { %196 = vmatpush.msra.mxu3 %v44_v11  ;;  %v217_v41 = vld [vmem:[%s373_s2] ss:$0 sm:$0xff]  ;;  %s245_s2 = smov [#allocation3]  }
  0x12   :  { %80 = vmatpush.msra.mxu0 %v43_v12  ;;  %197 = vmatpush.msra.mxu2 %v43_v12  ;;  %v32_v30 = vld [vmem:[#allocation2] sm:$0xff]  ;;  %s162_s12 = sshll.u32 %s245_s2, 4  ;;  %s163_s12 = int_to_ptr.vmem [resolvable:$true] %s162_s12 }
  0x13   :  { %198 = vmatpush.msra.mxu3 %v43_v12  ;;  %178 = vmatmul.msk.f32.gmra.mxu1 %vm55_vm1, %v27_v13  ;;  %v33_v35 = vld [vmem:[#allocation2 + $0x8] sm:$0xff] }
  0x14   :  { %81 = vmatpush.msra.mxu0 %v42_v14  ;;  %199 = vmatpush.msra.mxu2 %v42_v14  ;;  %v34_v38 = vld [vmem:[#allocation2 + $0x10] sm:$0xff] }
  0x15   :  { %200 = vmatpush.msra.mxu3 %v42_v14  ;;  %v35_v48 = vld [vmem:[#allocation2 + $0x18] sm:$0xff] }
  0x16   :  { %82 = vmatpush.msra.mxu0 %v41_v15  ;;  %201 = vmatpush.msra.mxu2 %v41_v15 }
  0x17   :  { %202 = vmatpush.msra.mxu3 %v41_v15 }
  0x18   :  { %83 = vmatpush.msra.mxu0 %v40_v16  ;;  %203 = vmatpush.msra.mxu2 %v40_v16 }
  0x19   :  { %204 = vmatpush.msra.mxu3 %v40_v16 }
  0x1a   :  { %84 = vmatpush.msra.mxu0 %v39_v17  ;;  %205 = vmatpush.msra.mxu2 %v39_v17 }
  0x1b   :  { %206 = vmatpush.msra.mxu3 %v39_v17  ;;  %179 = vmatmul.msk.f32.gmra.mxu1 %vm55_vm1, %v29_v18 }
  0x1c   :  { %85 = vmatpush.msra.mxu0 %v38_v19  ;;  %207 = vmatpush.msra.mxu2 %v38_v19 }
  0x1d   :  { %208 = vmatpush.msra.mxu3 %v38_v19 }
  0x1e   :  { %86 = vmatpush.msra.mxu0 %v37_v20  ;;  %209 = vmatpush.msra.mxu2 %v37_v20 }
  0x1f   :  { %210 = vmatpush.msra.mxu3 %v37_v20 }
  0x20   :  { %87 = vmatpush.msra.mxu0 %v36_v21  ;;  %211 = vmatpush.msra.mxu2 %v36_v21 }
  0x21   :  { %212 = vmatpush.msra.mxu3 %v36_v21  ;;  %88 = vmatmul.f32.vlgmr.msra.gmra.mxu0 %v24_v22 }
  0x22   :  { %91 = vmatmul.f32.vlgmr.msra.gmra.mxu2 %v26_v23  ;;  %94 = vmatmul.f32.vlgmr.msra.gmra.mxu3 %v28_v24 }
  0x23   :  { %180 = vmatmul.msk.f32.gmra.mxu1 %vm55_vm1, %v31_v25 }
  0x2a   :  { %97 = vmatmul.f32.gmra.mxu3 %v30_v26 }
  0x88   :  { %v118_v28 = vpop.f32.mrf.mxu1 }
  0x90   :  { %v121_v29 = vpop.f32.mrf.mxu1 }
  0x98   :  { %v124_v34 = vpop.f32.mrf.mxu1 }
  0x9e   :  { %v89_v31 = vpop.f32.mrf.mxu0 }
  0x9f   :  { %v119_v32 = vadd.f32 %v118_v28, %v89_v31 }
  0xa0   :  { %v127_v45 = vpop.f32.mrf.mxu1 }
  0xa1   :  { %v130_v33 = vadd.f32 %v119_v32, %v32_v30 }
  0xa3   :  { %135 = vst.msk [vmem:[#allocation2] sm:$0xff] %vm19_vm2, %v130_v33 }
  0xa5   :  { %v92_v36 = vpop.f32.mrf.mxu2  ;;  %v95_v37 = vpop.f32.mrf.mxu3 }
  0xa6   :  { %v122_v39 = vadd.f32 %v121_v29, %v92_v36  ;;  %v125_v40 = vadd.f32 %v124_v34, %v95_v37 }
  0xa8   :  { %v131_v42 = vadd.f32 %v122_v39, %v33_v35  ;;  %v132_v43 = vadd.f32 %v125_v40, %v34_v38 }
  0xaa   :  { %136 = vst.msk [vmem:[#allocation2 + $0x8] sm:$0xff] %vm19_vm2, %v131_v42  ;;  %v142_v44 = vld [vmem:[#allocation2] sm:$0xff] }
  0xab   :  { %137 = vst.msk [vmem:[#allocation2 + $0x10] sm:$0xff] %vm19_vm2, %v132_v43  ;;  %v150_v46 = vadd.f32 %v217_v41, %v142_v44 }
  0xad   :  { %v98_v47 = vpop.f32.mrf.mxu3  ;;  %154 = vst.msk [vmem:[#allocation3] sm:$0xff] %vm19_vm2, %v150_v46 }
  0xae   :  { %v128_v49 = vadd.f32 %v127_v45, %v98_v47 }
  0xb0   :  { %v133_v50 = vadd.f32 %v128_v49, %v35_v48 }
  0xb1   :  { %v143_v51 = vld [vmem:[#allocation2 + $0x8] sm:$0xff] }
  0xb2   :  { %138 = vst.msk [vmem:[#allocation2 + $0x18] sm:$0xff] %vm19_vm2, %v133_v50  ;;  %v144_v52 = vld [vmem:[#allocation2 + $0x10] sm:$0xff]  ;;  %v151_v53 = vadd.f32 %v217_v41, %v143_v51 }
  0xb3   :  { %v152_v54 = vadd.f32 %v217_v41, %v144_v52 }
  0xb4   :  { %155 = vst.msk [vmem:[#allocation3 + $0x8] sm:$0xff] %vm19_vm2, %v151_v53 }
  0xb5   :  { %156 = vst.msk [vmem:[#allocation3 + $0x10] sm:$0xff] %vm19_vm2, %v152_v54 }
  0xb9   :  { %v145_v55 = vld [vmem:[#allocation2 + $0x18] sm:$0xff] }
  0xba   :  { %v153_v56 = vadd.f32 %v217_v41, %v145_v55 }
  0xbc   :  { %157 = vst.msk [vmem:[#allocation3 + $0x18] sm:$0xff] %vm19_vm2, %v153_v56 }
  0xbd   :  { %170 = dma.vmem_to_hbm [thread:$0]  %s163_s12, 512, %s165_s15, [#allocation4], %s246_s16, %s246_s16, %s247_s17  }
  0xbe   :  { %242 = dma.done.wait [#allocation4], 512  }
  0xbf   :  { %243 = vsyncadd [#allocation4], 4294966784 }
  0xc0   :  { %175 = vsyncpa [#allocation4], 1 }

</bundles_post_ra>
